<compile_context>
chip_gen: v5e
topology: v5e:2x2
jax: 0.10.0
libtpu: 0.0.40
codegen_flags: <defaults>
</compile_context>

<pallas_src>
import math

import jax
import jax.numpy as jnp
from jax.experimental import pallas as pl
from jax.experimental.pallas import tpu as pltpu


_MIB = 1024 * 1024
# Double-buffered tile footprint budget: safe on v7x (64 MiB physical VMEM),
# leaves plenty of headroom on v5e/v6e (128 MiB).
_VMEM_BUDGET = 40 * _MIB


def _round_up(x, m):
    return ((x + m - 1) // m) * m


# ---------------------------------------------------------------------------
# Kernels
# ---------------------------------------------------------------------------
# Single-shot kernels: whole K extent in one tile -> one pure MXU matmul plus
# bias + ReLU epilogue per (i, j) grid point. No accumulator scratch needed.
def _fc_relu_kernel(x_ref, wt_ref, b_ref, out_ref):
    acc = jnp.dot(x_ref[...], wt_ref[...], preferred_element_type=jnp.float32)
    out_ref[...] = jnp.maximum(acc + b_ref[...], 0.0).astype(out_ref.dtype)


def _fc_relu_pre_kernel(x_ref, wt_ref, b_ref, out_ref, pre_ref):
    acc = jnp.dot(x_ref[...], wt_ref[...], preferred_element_type=jnp.float32)
    pre = acc + b_ref[...]
    pre_ref[...] = pre.astype(pre_ref.dtype)
    out_ref[...] = jnp.maximum(pre, 0.0).astype(out_ref.dtype)


# K-tiled fallback (only for very large in_features). The f32 output block's
# index map ignores k, so it is VMEM-resident across the K loop and doubles as
# the accumulator (no scratch).
def _fc_relu_kernel_ktiled(x_ref, wt_ref, b_ref, out_ref):
    k = pl.program_id(2)

    @pl.when(k == 0)
    def _():
        out_ref[...] = jnp.zeros_like(out_ref)

    out_ref[...] += jnp.dot(x_ref[...], wt_ref[...],
                            preferred_element_type=jnp.float32)

    @pl.when(k == pl.num_programs(2) - 1)
    def _():
        out_ref[...] = jnp.maximum(out_ref[...] + b_ref[...], 0.0)


def _fc_relu_pre_kernel_ktiled(x_ref, wt_ref, b_ref, out_ref, pre_ref):
    k = pl.program_id(2)

    @pl.when(k == 0)
    def _():
        pre_ref[...] = jnp.zeros_like(pre_ref)

    pre_ref[...] += jnp.dot(x_ref[...], wt_ref[...],
                            preferred_element_type=jnp.float32)

    @pl.when(k == pl.num_programs(2) - 1)
    def _():
        pre = pre_ref[...] + b_ref[...]
        pre_ref[...] = pre
        out_ref[...] = jnp.maximum(pre, 0.0)


# ---------------------------------------------------------------------------
# Tile selection
# ---------------------------------------------------------------------------
def _footprint_bytes(tm, tn, tk, n_out):
    # bf16 x / W^T inputs and f32 bias, double-buffered; f32 outputs,
    # double-buffered for writeback overlap.
    in_buf = 2 * (tm * tk * 2 + tk * tn * 2 + tn * 4)
    out_buf = 2 * n_out * tm * tn * 4
    return in_buf + out_buf


def _choose_tm(m8):
    # Largest tm whose M over-padding stays under ~12.5% (always terminates at
    # tm=8 since m8 is a multiple of 8).
    for tm in (256, 128, 64, 32, 16, 8):
        if _round_up(m8, tm) * 8 <= m8 * 9:
            return tm
    return 8


def _tile_candidates(total):
    """128-multiples that evenly divide `total`, largest first."""
    return sorted((t for t in range(128, total + 1, 128) if total % t == 0),
                  reverse=True)


def _choose_tiles(m8, in_pad, out_pad, n_out):
    tm = _choose_tm(m8)
    # Prefer no K-tiling (tk == full in_pad) with the widest tn that fits.
    for tn in _tile_candidates(out_pad):
        if _footprint_bytes(tm, tn, in_pad, n_out) <= _VMEM_BUDGET:
            return tm, tn, in_pad, False
    # Fallback: K-tile (very large in_features).
    for tn in _tile_candidates(out_pad):
        for tk in _tile_candidates(in_pad):
            if _footprint_bytes(tm, tn, tk, n_out) <= _VMEM_BUDGET:
                return tm, tn, tk, True
    return tm, 128, 128, True  # last resort (always fits)


def _maybe_split_for_dual_tc(tm, tn, m8, out_pad):
    """Best effort: ensure >=2 parallel (M,N) blocks so v7x's second
    TensorCore gets work. Extra grid step is negligible on single-TC chips."""
    m_pad = _round_up(m8, tm)
    if (m_pad // tm) * (out_pad // tn) >= 2:
        return tm, tn
    if tn >= 256 and (tn // 2) % 128 == 0:
        return tm, tn // 2
    if tm >= 16 and m8 > tm // 2:
        return tm // 2, tn
    return tm, tn


# ---------------------------------------------------------------------------
# pallas_call builder
# ---------------------------------------------------------------------------
def _build_fc_call(m_pad, out_pad, in_pad, tm, tn, tk, k_tiled, with_pre):
    n_out = 2 if with_pre else 1
    out_shape = tuple(jax.ShapeDtypeStruct((m_pad, out_pad), jnp.float32)
                      for _ in range(n_out))

    if k_tiled:
        grid = (m_pad // tm, out_pad // tn, in_pad // tk)
        in_specs = [
            pl.BlockSpec((tm, tk), lambda i, j, k: (i, k)),   # x tile
            pl.BlockSpec((tk, tn), lambda i, j, k: (k, j)),   # W^T tile
            pl.BlockSpec((1, tn), lambda i, j, k: (0, j)),    # bias tile
        ]
        out_specs = [pl.BlockSpec((tm, tn), lambda i, j, k: (i, j))
                     for _ in range(n_out)]
        kernel = _fc_relu_pre_kernel_ktiled if with_pre else _fc_relu_kernel_ktiled
        dims = ("parallel", "parallel", "arbitrary")
    else:
        grid = (m_pad // tm, out_pad // tn)
        in_specs = [
            pl.BlockSpec((tm, tk), lambda i, j: (i, 0)),      # x tile (full K)
            # TODO(synk): if profiling on v7x still shows exposed DMA, add
            # pipeline_mode=pl.Buffered(3) to this W^T spec.
            pl.BlockSpec((tk, tn), lambda i, j: (0, j)),      # W^T tile
            pl.BlockSpec((1, tn), lambda i, j: (0, j)),       # bias tile
        ]
        out_specs = [pl.BlockSpec((tm, tn), lambda i, j: (i, j))
                     for _ in range(n_out)]
        kernel = _fc_relu_pre_kernel if with_pre else _fc_relu_kernel
        dims = ("parallel", "parallel")

    m_blocks = m_pad // tm
    n_blocks = out_pad // tn
    bytes_accessed = (n_blocks * m_pad * in_pad * 2        # x re-read per N-block
                      + m_blocks * in_pad * out_pad * 2    # W^T re-read per M-block
                      + m_blocks * n_blocks * tn * 4       # bias reads
                      + n_out * m_pad * out_pad * 4)       # writeback

    footprint = _footprint_bytes(tm, tn, tk, n_out)
    vmem_limit = int(min(max(footprint + 8 * _MIB, 32 * _MIB), 48 * _MIB))

    return pl.pallas_call(
        kernel,
        out_shape=out_shape,
        grid_spec=pltpu.PrefetchScalarGridSpec(
            num_scalar_prefetch=0,
            grid=grid,
            in_specs=in_specs,
            out_specs=out_specs,
        ),
        compiler_params=pltpu.CompilerParams(
            dimension_semantics=dims,
            vmem_limit_bytes=vmem_limit,
        ),
        cost_estimate=pl.CostEstimate(
            flops=2 * m_pad * in_pad * out_pad,
            transcendentals=0,
            bytes_accessed=bytes_accessed,
        ),
    )


# ---------------------------------------------------------------------------
# Parameter init / prep (one-time)
# ---------------------------------------------------------------------------
def init_fc_params(key, in_size, out_size):
    """Deterministic init matching LinearExcitability.reset_parameters."""
    stdv = 1.0 / math.sqrt(in_size)
    kw, kb = jax.random.split(key)
    weight = jax.random.uniform(kw, (out_size, in_size), jnp.float32,
                                minval=-stdv, maxval=stdv)
    bias = jax.random.uniform(kb, (out_size,), jnp.float32,
                              minval=-stdv, maxval=stdv)
    return weight, bias


def prepare_fc_params(weight, bias):
    """One-time: transpose to (in, out), zero-pad both axes to multiples of
    128 (lane-dense tiles) and cast the weight to bf16 (the weight stream is
    bandwidth-bound; MXU's native path is bf16). Bias stays f32 (tiny)."""
    out_size, in_size = weight.shape
    in_pad = _round_up(in_size, 128)
    out_pad = _round_up(out_size, 128)
    wt = jnp.zeros((in_pad, out_pad), jnp.bfloat16)
    wt = wt.at[:in_size, :out_size].set(weight.T.astype(jnp.bfloat16))
    b2 = jnp.zeros((1, out_pad), jnp.float32)
    b2 = b2.at[:, :out_size].set(bias.reshape(1, out_size))
    return wt, b2, (in_size, out_size)


def prepare_fc_input(x, in_size):
    """Optional producer-side helper: store activations bf16 and K-padded to a
    multiple of 128 so fc_layer_forward never pays a per-call pad/cast pass."""
    in_pad = _round_up(in_size, 128)
    x = x.astype(jnp.bfloat16)
    pad = in_pad - x.shape[-1]
    if pad > 0:
        x = jnp.pad(x, [(0, 0)] * (x.ndim - 1) + [(0, pad)])
    return x


# ---------------------------------------------------------------------------
# Forward
# ---------------------------------------------------------------------------
def fc_layer_forward(x, wt_padded, bias_padded, sizes, *,
                     gate_input=None, return_pa=False):
    """x: (N, *, in_size) (f32 or pre-prepared bf16/K-padded).
    wt_padded: (in_pad, out_pad) pre-transposed+padded bf16 weight.
    bias_padded: (1, out_pad) f32.
    Matches fc_layer_fixed_gates.forward for the default config
    (ReLU, bias, no dropout / batch-norm / fixed gates)."""
    del gate_input  # default config has gate_size=0 -> gate_input is ignored
    # TODO(synk): dropout / batch_norm / fixed-gate / excitability paths are
    # inactive in the default config and not implemented here.

    in_size, out_size = sizes
    in_pad, out_pad = wt_padded.shape

    lead = x.shape[:-1]
    feat = x.shape[-1]
    if feat not in (in_size, in_pad):
        raise ValueError(f"last dim {feat} must be in_size={in_size} or "
                         f"padded in_size={in_pad}")
    N = 1
    for d in lead:
        N *= d
    x2 = x.reshape(N, feat)

    m8 = _round_up(max(N, 1), 8)
    n_out = 2 if return_pa else 1
    tm, tn, tk, k_tiled = _choose_tiles(m8, in_pad, out_pad, n_out)
    tm, tn = _maybe_split_for_dual_tc(tm, tn, m8, out_pad)
    m_pad = _round_up(m8, tm)

    # Pad/cast x only if the caller did not pre-prepare it (single fused op;
    # zero K-padding contributes nothing to the matmul, extra rows are sliced
    # off below).
    if (m_pad != N) or (feat != in_pad):
        x2 = jnp.pad(x2.astype(jnp.bfloat16),
                     ((0, m_pad - N), (0, in_pad - feat)))
    elif x2.dtype != jnp.bfloat16:
        x2 = x2.astype(jnp.bfloat16)

    call = _build_fc_call(m_pad, out_pad, in_pad, tm, tn, tk, k_tiled,
                          return_pa)

    out_lead_shape = lead + (out_size,)
    if return_pa:
        out_p, pre_p = call(x2, wt_padded, bias_padded)
        return (out_p[:N, :out_size].reshape(out_lead_shape),
                pre_p[:N, :out_size].reshape(out_lead_shape))
    (out_p,) = call(x2, wt_padded, bias_padded)
    return out_p[:N, :out_size].reshape(out_lead_shape)


# ---------------------------------------------------------------------------
# Demo / correctness check
# ---------------------------------------------------------------------------
if __name__ == "__main__":
    key = jax.random.PRNGKey(0)
    kx, kx3, kp = jax.random.split(key, 3)

    batch, in_size, out_size = 8, 32, 32
    x = jax.random.normal(kx, (batch, in_size), jnp.float32)
    weight, bias = init_fc_params(kp, in_size, out_size)
    wt_p, b_p, sizes = prepare_fc_params(weight, bias)

    # 2-D input, with and without pre-activations.
    out, pre = fc_layer_forward(x, wt_p, b_p, sizes, return_pa=True)
    out_only = fc_layer_forward(prepare_fc_input(x, in_size), wt_p, b_p, sizes,
                                return_pa=False)

    # 3-D input (N, *, in_features) path.
    x3 = jax.random.normal(kx3, (2, 4, in_size), jnp.float32)
    out3 = fc_layer_forward(x3, wt_p, b_p, sizes, return_pa=False)

    jax.block_until_ready((out, pre, out_only, out3))

    # Exact-path reference: same bf16 operands, f32 accumulation.
    pre_ref = jnp.dot(x.astype(jnp.bfloat16),
                      weight.astype(jnp.bfloat16).T,
                      preferred_element_type=jnp.float32) + bias
    out_ref = jnp.maximum(pre_ref, 0.0)
    assert jnp.allclose(pre, pre_ref, atol=1e-4, rtol=1e-4), "pre mismatch"
    assert jnp.allclose(out, out_ref, atol=1e-4, rtol=1e-4), "out mismatch"
    assert jnp.allclose(out_only, out_ref, atol=1e-4, rtol=1e-4), "out-only mismatch"

    # Loose check vs the full-f32 PyTorch-equivalent reference (bf16 inputs).
    pre_f32 = x @ weight.T + bias
    out_f32 = jnp.maximum(pre_f32, 0.0)
    assert jnp.allclose(pre, pre_f32, atol=5e-2, rtol=5e-2), "pre f32 drift"
    assert jnp.allclose(out, out_f32, atol=5e-2, rtol=5e-2), "out f32 drift"

    pre3_ref = jnp.dot(x3.astype(jnp.bfloat16),
                       weight.astype(jnp.bfloat16).T,
                       preferred_element_type=jnp.float32) + bias
    assert jnp.allclose(out3, jnp.maximum(pre3_ref, 0.0),
                        atol=1e-4, rtol=1e-4), "3-D input mismatch"

    print("KERNEL_OK")
</pallas_src>

<mosaic_0001>
module attributes {stable_mosaic.version = 11 : i64} {
  func.func @_fc_relu_pre_kernel(%arg0: i32, %arg1: i32, %arg2: memref<8x128xbf16, #tpu.memory_space<vmem>>, %arg3: memref<128x128xbf16, #tpu.memory_space<vmem>>, %arg4: memref<1x128xf32, #tpu.memory_space<vmem>>, %arg5: memref<8x128xf32, #tpu.memory_space<vmem>>, %arg6: memref<8x128xf32, #tpu.memory_space<vmem>>) attributes {dimension_semantics = [#tpu.dimension_semantics<parallel>, #tpu.dimension_semantics<parallel>], iteration_bounds = array<i64: 1, 1>, scalar_prefetch = 0 : i64, scratch_operands = 0 : i64, tpu.core_type = #tpu.core_type<tc>, window_params = [{transform_indices = @transform_0, window_bounds = array<i64: 8, 128>}, {transform_indices = @transform_1, window_bounds = array<i64: 128, 128>}, {transform_indices = @transform_2, window_bounds = array<i64: 1, 128>}, {transform_indices = @transform_3, window_bounds = array<i64: 8, 128>}, {transform_indices = @transform_4, window_bounds = array<i64: 8, 128>}]} {
    %c0 = arith.constant 0 : index
    %c0_0 = arith.constant 0 : index
    %0 = vector.load %arg2[%c0, %c0_0] : memref<8x128xbf16, #tpu.memory_space<vmem>>, vector<8x128xbf16>
    %c0_1 = arith.constant 0 : index
    %c0_2 = arith.constant 0 : index
    %1 = vector.load %arg3[%c0_1, %c0_2] : memref<128x128xbf16, #tpu.memory_space<vmem>>, vector<128x128xbf16>
    %cst = arith.constant dense<0.000000e+00> : vector<8x128xf32>
    %2 = tpu.matmul %0, %1, %cst {dimension_numbers = #tpu.dot_dimension_numbers<[1], [0], [0], [1], [0, 0, 1, 1], [], []>} : vector<8x128xbf16>, vector<128x128xbf16>, vector<8x128xf32> -> vector<8x128xf32>
    %c0_3 = arith.constant 0 : index
    %c0_4 = arith.constant 0 : index
    %3 = vector.load %arg4[%c0_3, %c0_4] : memref<1x128xf32, #tpu.memory_space<vmem>>, vector<1x128xf32>
    %4 = vector.broadcast %3 : vector<1x128xf32> to vector<8x128xf32>
    %5 = arith.addf %2, %4 : vector<8x128xf32>
    %c0_5 = arith.constant 0 : index
    %c0_6 = arith.constant 0 : index
    %6 = vector.load %arg6[%c0_5, %c0_6] : memref<8x128xf32, #tpu.memory_space<vmem>>, vector<8x128xf32>
    tpu.vector_store %arg6[%c0_5, %c0_6], %5 {strides = array<i32>} : memref<8x128xf32, #tpu.memory_space<vmem>>, vector<8x128xf32>,
    %cst_7 = arith.constant 0.000000e+00 : f32
    %7 = vector.broadcast %cst_7 : f32 to vector<8x128xf32>
    %8 = arith.maximumf %5, %7 : vector<8x128xf32>
    %c0_8 = arith.constant 0 : index
    %c0_9 = arith.constant 0 : index
    %9 = vector.load %arg5[%c0_8, %c0_9] : memref<8x128xf32, #tpu.memory_space<vmem>>, vector<8x128xf32>
    tpu.vector_store %arg5[%c0_8, %c0_9], %8 {strides = array<i32>} : memref<8x128xf32, #tpu.memory_space<vmem>>, vector<8x128xf32>,
    return
  }
  func.func @transform_0(%arg0: i32, %arg1: i32) -> (i32, i32) {
    %c0_i32 = arith.constant 0 : i32
    %c0_i32_0 = arith.constant 0 : i32
    return %arg0, %c0_i32 : i32, i32
  }
  func.func @transform_1(%arg0: i32, %arg1: i32) -> (i32, i32) {
    %c0_i32 = arith.constant 0 : i32
    %c0_i32_0 = arith.constant 0 : i32
    return %c0_i32, %arg1 : i32, i32
  }
  func.func @transform_2(%arg0: i32, %arg1: i32) -> (i32, i32) {
    %c0_i32 = arith.constant 0 : i32
    %c0_i32_0 = arith.constant 0 : i32
    return %c0_i32, %arg1 : i32, i32
  }
  func.func @transform_3(%arg0: i32, %arg1: i32) -> (i32, i32) {
    %c0_i32 = arith.constant 0 : i32
    return %arg0, %arg1 : i32, i32
  }
  func.func @transform_4(%arg0: i32, %arg1: i32) -> (i32, i32) {
    %c0_i32 = arith.constant 0 : i32
    return %arg0, %arg1 : i32, i32
  }
}

</mosaic_0001>

<bundles_post_ra>
// kernel: tpu_custom_call.1
= control target key start
LH: loop header
LB: loop body
LE: loop exit
PB: predicated region body
PF: predicated region fallthrough
CT: control target
= control target key end

     0   :  { %10 = vsyncpa [#allocation3], 0  ;;  %s364_s0 = inlined_call_operand.hbm [shape: bf16[8,128], index: 0, kind: input, shape index: {}]   ;;  %s365_s1 = inlined_call_operand.hbm [shape: bf16[128,128], index: 1, kind: input, shape index: {}]   ;;  %s366_s2 = inlined_call_operand.vmem [shape: f32[1,128], index: 2, kind: input, shape index: {}]   ;;  %s367_s3 = inlined_call_operand.hbm [shape: f32[8,128], index: 3, kind: output, shape index: {0}]   ;;  %s368_s4 = inlined_call_operand.hbm [shape: f32[8,128], index: 4, kind: output, shape index: {1}]  }
   0x1   :  { %11 = vsyncpa [#allocation6], 0 }
   0x2   :  { %12 = vsyncpa [#allocation4], 0 }
   0x3   :  { %13 = vsyncpa [#allocation9], 0  ;;  %s19_s17 = sshll.u32 %s364_s0, 4  ;;  %s318_s18 = smov [#allocation2]   ;;  %s20_s17 = int_to_ptr.hbm [resolvable:$true] %s19_s17 }
   0x4   :  { %s21_s19 = sshll.u32 %s318_s18, 4  ;;  %s29_s22 = sshll.u32 %s365_s1, 4  ;;  %s22_s19 = int_to_ptr.vmem [resolvable:$true] %s21_s19  ;;  %s30_s22 = int_to_ptr.hbm [resolvable:$true] %s29_s22 }
   0x5   :  { %24 = dma.hbm_to_vmem [thread:$0]  %s20_s17, 64, %s22_s19, [#allocation3]  }
   0x6   :  { %s319_s23 = smov [#allocation5]   ;;  %s320_s25 = smov 64  }
   0x7   :  { %s31_s24 = sshll.u32 %s319_s23, 4  ;;  %s321_s26 = smov 4   ;;  %s32_s24 = int_to_ptr.vmem [resolvable:$true] %s31_s24 }
   0x8   :  { %37 = dma.hbm_to_vmem [thread:$0]  %s30_s22, 1024, %s32_s24, [#allocation6], %s320_s25, %s320_s25, %s321_s26  }
   0x9   :  { %310 = dma.done.wait [#allocation3], 64  }
   0xa   :  { %311 = vsyncadd [#allocation3], 4294967232 }
   0xb   :  { %312 = dma.done.wait [#allocation6], 1024  }
   0xc   :  { %313 = vsyncadd [#allocation6], 4294966272  ;;  %v206_v0 = vld [vmem:[#allocation5 + $0x38] sm:$0xff]  ;;  %v205_v1 = vld [vmem:[#allocation5 + $0x30] sm:$0xff]  ;;  %s322_s27 = smov [#allocation8]   ;;  %s151_s5 = sshll.u32 %s368_s4, 4  ;;  %s152_s5 = int_to_ptr.hbm [resolvable:$true] %s151_s5 }
   0xd   :  { %117 = vmatpush.bf16.msra.mxu0 %v206_v0  ;;  %v204_v2 = vld [vmem:[#allocation5 + $0x28] sm:$0xff]  ;;  %v203_v3 = vld [vmem:[#allocation5 + $0x20] sm:$0xff]  ;;  %v202_v4 = vld [vmem:[#allocation5 + $0x18] sm:$0xff]  ;;  %s149_s28 = sshll.u32 %s322_s27, 4  ;;  %s323_s6 = smov [#allocation7]   ;;  %s150_s28 = int_to_ptr.vmem [resolvable:$true] %s149_s28 }
   0xe   :  { %v201_v5 = vld [vmem:[#allocation5 + $0x10] sm:$0xff]  ;;  %v200_v6 = vld [vmem:[#allocation5 + $0x8] sm:$0xff]  ;;  %v199_v7 = vld [vmem:[#allocation5] sm:$0xff]  ;;  %s138_s7 = sshll.u32 %s323_s6, 4  ;;  %s140_s10 = sshll.u32 %s367_s3, 4  ;;  %s139_s7 = int_to_ptr.vmem [resolvable:$true] %s138_s7  ;;  %s141_s10 = int_to_ptr.hbm [resolvable:$true] %s140_s10 }
   0xf   :  { %v48_v8 = vld [vmem:[#allocation2] sm:$0xf] }
  0x10   :  { %v213_v9 = vld [vmem:[%s366_s2] ss:$0 sm:$0xff] }
  0x11   :  { %118 = vmatpush.bf16.msra.mxu0 %v205_v1 }
  0x15   :  { %119 = vmatpush.bf16.msra.mxu0 %v204_v2 }
  0x19   :  { %120 = vmatpush.bf16.msra.mxu0 %v203_v3 }
  0x1d   :  { %121 = vmatpush.bf16.msra.mxu0 %v202_v4 }
  0x21   :  { %122 = vmatpush.bf16.msra.mxu0 %v201_v5 }
  0x25   :  { %123 = vmatpush.bf16.msra.mxu0 %v200_v6 }
  0x29   :  { %124 = vmatpush.bf16.msra.mxu0 %v199_v7 }
  0x2c   :  { %125 = vmatmul.bf16.vlgmr.msra.gmra.mxu0 %v48_v8 }
  0xa9   :  { %v126_v10 = vpop.f32.mrf.mxu0 }
  0xaa   :  { %v127_v11 = vadd.f32 %v213_v9, %v126_v10 }
  0xac   :  { %130 = vst [vmem:[#allocation8] sm:$0xff] %v127_v11  ;;  %v131_v12 = vmax.f32 %v127_v11, 0.0 }
  0xad   :  { %154 = dma.vmem_to_hbm [thread:$0]  %s150_s28, 128, %s152_s5, [#allocation9]  }
  0xae   :  { %132 = vst [vmem:[#allocation7] sm:$0xff] %v131_v12 }
  0xaf   :  { %143 = dma.vmem_to_hbm [thread:$0]  %s139_s7, 128, %s141_s10, [#allocation4]  }
  0xb1   :  { %v128_v13 = vpop.f32.mrf.mxu0 }
  0xb2   :  { %314 = dma.done.wait [#allocation4], 128  }
  0xb3   :  { %315 = vsyncadd [#allocation4], 4294967168 }
  0xb4   :  { %316 = dma.done.wait [#allocation9], 128  }
  0xb5   :  { %317 = vsyncadd [#allocation9], 4294967168 }
  0xb6   :  { %163 = vsyncpa [#allocation3], 1 }
  0xb7   :  { %164 = vsyncpa [#allocation6], 1 }
  0xb8   :  { %165 = vsyncpa [#allocation4], 1 }
  0xb9   :  { %166 = vsyncpa [#allocation9], 1 }

</bundles_post_ra>
